<compile_context>
chip_gen: v6e
topology: v6e:2x2x1
jax: 0.10.0
libtpu: 0.0.40
codegen_flags: <defaults>
</compile_context>

<pallas_src>
import jax
import jax.numpy as jnp
from jax.experimental import pallas as pl
from jax.experimental.pallas import tpu as pltpu

ALPHA = 0.01

LANE = 1024        # lane-dense last dim, multiple of 128
TILE_ROWS = 512    # rows per tile -> 512*1024*4 B = 2 MiB per f32 buffer


def _alrelu_kernel(x_ref, o_ref):
    x = x_ref[...]
    # alpha > 0 so |alpha*x| == alpha*|x|; no explicit upcast, keep input dtype.
    o_ref[...] = jnp.maximum(ALPHA * jnp.abs(x), x)


def alrelu(x: jax.Array) -> jax.Array:
    """Elementwise AlReLU via a tiled, pipelined Pallas TPU kernel."""
    orig_shape = x.shape
    n = x.size

    # Tiny inputs: pallas_call fixed overhead dominates; plain XLA is faster.
    if n < LANE:
        return jnp.maximum(ALPHA * jnp.abs(x), x)

    # Re-lay out as lane-dense (rows, LANE); pad the tail to a full row.
    flat = x.reshape(-1)
    pad_tail = (-n) % LANE
    if pad_tail:
        flat = jnp.pad(flat, (0, pad_tail))
    rows = flat.size // LANE
    x2d = flat.reshape(rows, LANE)

    if rows <= TILE_ROWS:
        # Small array (<= ~2 MiB f32): one block covering the full extent
        # (block dims equal to array dims, so (8,128) alignment is not required).
        tile_rows = rows
        grid = (1,)
    else:
        # Large array: fixed (TILE_ROWS, LANE) tiles streamed over a 1-D grid.
        tile_rows = TILE_ROWS
        pad_rows = (-rows) % tile_rows
        if pad_rows:
            x2d = jnp.pad(x2d, ((0, pad_rows), (0, 0)))
            rows += pad_rows
        grid = (rows // tile_rows,)

    out2d = pl.pallas_call(
        _alrelu_kernel,
        out_shape=jax.ShapeDtypeStruct(x2d.shape, x2d.dtype),
        grid=grid,
        in_specs=[pl.BlockSpec((tile_rows, LANE), lambda i: (i, 0))],
        out_specs=pl.BlockSpec((tile_rows, LANE), lambda i: (i, 0)),
        compiler_params=pltpu.CompilerParams(
            dimension_semantics=("parallel",)),
    )(x2d)

    return out2d.reshape(-1)[:n].reshape(orig_shape)


if __name__ == "__main__":
    key = jax.random.PRNGKey(0)
    x = jax.random.normal(key, (2, 4, 16, 16), dtype=jnp.float32)

    y = alrelu(x)
    y = jax.block_until_ready(y)

    # Reference (plain JAX), matching torch.maximum(torch.abs(alpha * x), x).
    y_ref = jnp.maximum(jnp.abs(ALPHA * x), x)
    assert y.shape == x.shape and y.dtype == x.dtype
    assert jnp.allclose(y, y_ref, atol=1e-6, rtol=1e-6)

    # Also sanity-check the large, tiled path once.
    xl = jax.random.normal(jax.random.PRNGKey(1), (8, 16, 64, 64), dtype=jnp.float32)
    yl = jax.block_until_ready(alrelu(xl))
    assert jnp.allclose(yl, jnp.maximum(jnp.abs(ALPHA * xl), xl), atol=1e-6, rtol=1e-6)

    print("KERNEL_OK")
</pallas_src>

<mosaic_0001>
module attributes {stable_mosaic.version = 11 : i64} {
  func.func @_alrelu_kernel(%arg0: i32, %arg1: memref<2x1024xf32, #tpu.memory_space<vmem>>, %arg2: memref<2x1024xf32, #tpu.memory_space<vmem>>) attributes {dimension_semantics = [#tpu.dimension_semantics<parallel>], iteration_bounds = array<i64: 1>, scalar_prefetch = 0 : i64, scratch_operands = 0 : i64, tpu.core_type = #tpu.core_type<tc>, window_params = [{transform_indices = @transform_0, window_bounds = array<i64: 2, 1024>}, {transform_indices = @transform_1, window_bounds = array<i64: 2, 1024>}]} {
    %c0 = arith.constant 0 : index
    %c0_0 = arith.constant 0 : index
    %0 = vector.load %arg1[%c0, %c0_0] : memref<2x1024xf32, #tpu.memory_space<vmem>>, vector<2x1024xf32>
    %1 = math.absf %0 : vector<2x1024xf32>
    %cst = arith.constant 0.00999999977 : f32
    %2 = vector.broadcast %cst : f32 to vector<2x1024xf32>
    %3 = arith.mulf %2, %1 : vector<2x1024xf32>
    %4 = arith.maximumf %3, %0 : vector<2x1024xf32>
    %c0_1 = arith.constant 0 : index
    %c0_2 = arith.constant 0 : index
    %5 = vector.load %arg2[%c0_1, %c0_2] : memref<2x1024xf32, #tpu.memory_space<vmem>>, vector<2x1024xf32>
    tpu.vector_store %arg2[%c0_1, %c0_2], %4 {strides = array<i32>} : memref<2x1024xf32, #tpu.memory_space<vmem>>, vector<2x1024xf32>,
    return
  }
  func.func @transform_0(%arg0: i32) -> (i32, i32) {
    %c0_i32 = arith.constant 0 : i32
    %c0_i32_0 = arith.constant 0 : i32
    return %arg0, %c0_i32 : i32, i32
  }
  func.func @transform_1(%arg0: i32) -> (i32, i32) {
    %c0_i32 = arith.constant 0 : i32
    %c0_i32_0 = arith.constant 0 : i32
    return %arg0, %c0_i32 : i32, i32
  }
}

</mosaic_0001>

<bundles_post_ra>
// kernel: tpu_custom_call.1
= control target key start
LH: loop header
LB: loop body
LE: loop exit
PB: predicated region body
PF: predicated region fallthrough
CT: control target
= control target key end

     0   :  { %6 = vsyncpa [#allocation3], 0  ;;  %s110_s0 = inlined_call_operand.hbm [shape: f32[2,1024], index: 0, kind: input, shape index: {}]   ;;  %s111_s1 = inlined_call_operand.hbm [shape: f32[2,1024], index: 1, kind: output, shape index: {}]  }
   0x1   :  { %7 = vsyncpa [#allocation4], 0  ;;  %s92_s6 = smov [#allocation2]  }
   0x2   :  { %s14_s7 = sshll.u32 %s92_s6, 4  ;;  %s15_s7 = int_to_ptr.vmem [resolvable:$true] %s14_s7 }
   0x3   :  { %s56_s8 = scalar_lea.vmem %s15_s7, 256  ;;  %p61_p1 = scmp.lt.s32.totalorder %s15_s7, %s15_s7 }
   0x4   :  { %p57_p0 = scmp.ne.s32.totalorder %s15_s7, %s56_s8  ;;  %p62_p2 = scmp.lt.s32.totalorder %s56_s8, %s56_s8 }
   0x6   :  { %p63_p3 = por %p62_p2, %p61_p1 }
   0x8   :  { %p64_p4 = pnand %p63_p3, %p57_p0 }
   0xa   :  { %67 = shalt.err (!%p64_p4)
}
   0xb   :  { %17 = dma.hbm_to_vmem [thread:$0]  %s110_s0, 256, %s15_s7, [#allocation3]  }
   0xc   :  { %88 = dma.done.wait [#allocation3], 256  }
   0xd   :  { %89 = vsyncadd [#allocation3], 4294967040  ;;  %v21_v0 = vld [vmem:[#allocation2] sm:$0xff]  ;;  %v22_v1 = vld [vmem:[#allocation2 + $0x8] sm:$0xff]  ;;  %s93_s11 = smov [#allocation5]  }
   0xe   :  { %v23_v2 = vand.u32 2147483647, %v21_v0  ;;  %v24_v3 = vand.u32 2147483647, %v22_v1  ;;  %s37_s12 = sshll.u32 %s93_s11, 4  ;;  %s38_s12 = int_to_ptr.vmem [resolvable:$true] %s37_s12 }
   0xf   :  { %s68_s13 = scalar_lea.vmem %s38_s12, 256  ;;  %p73_p6 = scmp.lt.s32.totalorder %s38_s12, %s38_s12 }
  0x10   :  { %v25_v4 = vmul.f32 0.01, %v23_v2  ;;  %v26_v5 = vmul.f32 0.01, %v24_v3  ;;  %p69_p5 = scmp.ne.s32.totalorder %s38_s12, %s68_s13  ;;  %p74_p7 = scmp.lt.s32.totalorder %s68_s13, %s68_s13 }
  0x12   :  { %v27_v6 = vmax.f32 %v25_v4, %v21_v0  ;;  %v28_v7 = vmax.f32 %v26_v5, %v22_v1  ;;  %p75_p8 = por %p74_p7, %p73_p6 }
  0x14   :  { %29 = vst [vmem:[#allocation5] sm:$0xff] %v27_v6  ;;  %30 = vst [vmem:[#allocation5 + $0x8] sm:$0xff] %v28_v7  ;;  %p76_p9 = pnand %p75_p8, %p69_p5 }
  0x16   :  { %79 = shalt.err (!%p76_p9)
}
  0x17   :  { %40 = dma.vmem_to_hbm [thread:$0]  %s38_s12, 256, %s111_s1, [#allocation4]  }
  0x18   :  { %90 = dma.done.wait [#allocation4], 256  }
  0x19   :  { %91 = vsyncadd [#allocation4], 4294967040 }
  0x1a   :  { %44 = vsyncpa [#allocation3], 1 }
  0x1b   :  { %45 = vsyncpa [#allocation4], 1 }

</bundles_post_ra>
